<compile_context>
chip_gen: v7x
topology: tpu7x:2x2x1
jax: 0.10.0
libtpu: 0.0.40
codegen_flags: <defaults>
</compile_context>

<pallas_src>
import functools

import jax
import jax.numpy as jnp
from jax.experimental import pallas as pl
from jax.experimental.pallas import tpu as pltpu

_LANES = 128
_TM_SLAB = 256  # slab-row tile => _TM_SLAB * G original rows per grid step


def _highway_tts_kernel(x_ref, w_in_ref, b_in_ref, w_hw_ref, b_hw_ref,
                        w_out_ref, b_out_ref, o_ref, *, num_highway, slab):
    # x_ref:     (tm, G*D_in)       bf16 packed row slab
    # w_in_ref:  (G*D_in, slab)     bf16 block-diagonal first Linear
    # w_hw_ref:  (L, slab, 2*slab)  bf16; [..., :slab] = Wh blockdiag, [..., slab:] = Wt blockdiag
    # w_out_ref: (slab, slab)       bf16 block-diagonal final Linear
    # biases are f32; all accumulation / elementwise work is f32.
    h = (jnp.dot(x_ref[...], w_in_ref[...], preferred_element_type=jnp.float32)
         + b_in_ref[...])

    for l in range(num_highway):  # static unroll: num_highway is small
        ht = (jnp.dot(h.astype(w_hw_ref.dtype), w_hw_ref[l],
                      preferred_element_type=jnp.float32) + b_hw_ref[l])
        hh = jnp.maximum(ht[:, :slab], 0.0)       # relu half   (VPU)
        tt = jax.nn.sigmoid(ht[:, slab:])         # gate half   (EUP)
        h = h + tt * (hh - h)                     # fused highway blend (f32)

    out = (jnp.dot(h.astype(w_out_ref.dtype), w_out_ref[...],
                   preferred_element_type=jnp.float32) + b_out_ref[...])
    o_ref[...] = out.astype(o_ref.dtype)


def _block_diag(w, g):
    """(din, dout) -> (g*din, g*dout) block-diagonal replication of w."""
    din, dout = w.shape
    eye = jnp.eye(g, dtype=w.dtype)
    return (eye[:, None, :, None] * w[None, :, None, :]).reshape(g * din, g * dout)


def _pack_params(params, g, compute_dtype):
    """Block-diagonalise / lane-tile the module parameters for the slab layout."""
    L = params["wh"].shape[0]
    w_in = _block_diag(params["w_in"], g).astype(compute_dtype)
    b_in = jnp.tile(params["b_in"], (1, g)).astype(jnp.float32)
    w_hw = jnp.stack([
        jnp.concatenate([_block_diag(params["wh"][l], g),
                         _block_diag(params["wt"][l], g)], axis=1)
        for l in range(L)]).astype(compute_dtype)
    b_hw = jnp.stack([
        jnp.concatenate([jnp.tile(params["bh"][l], (1, g)),
                         jnp.tile(params["bt"][l], (1, g))], axis=1)
        for l in range(L)]).astype(jnp.float32)
    w_out = _block_diag(params["w_out"], g).astype(compute_dtype)
    b_out = jnp.tile(params["b_out"], (1, g)).astype(jnp.float32)
    return w_in, b_in, w_hw, b_hw, w_out, b_out


def init_params(key, input_dim, mel_dim, num_layers, ratio):
    """Deterministic synthetic parameters matching the module's shapes."""
    hidden = mel_dim * ratio
    L = num_layers - 1  # number of Highway layers
    ks = jax.random.split(key, 4)
    s_in = 1.0 / jnp.sqrt(jnp.float32(input_dim))
    s_h = 1.0 / jnp.sqrt(jnp.float32(hidden))
    return dict(
        w_in=jax.random.normal(ks[0], (input_dim, hidden), jnp.float32) * s_in,
        b_in=jnp.zeros((1, hidden), jnp.float32),
        wh=jax.random.normal(ks[1], (L, hidden, hidden), jnp.float32) * s_h,
        bh=jnp.zeros((L, 1, hidden), jnp.float32),
        wt=jax.random.normal(ks[2], (L, hidden, hidden), jnp.float32) * s_h,
        bt=jnp.full((L, 1, hidden), -1.0, jnp.float32),  # standard Highway gate bias init
        w_out=jax.random.normal(ks[3], (hidden, hidden), jnp.float32) * s_h,
        b_out=jnp.zeros((1, hidden), jnp.float32),
    )


def highway_tts_forward(inputs, input_lengths, teacher, params, ratio, tf_rate=0.0):
    # TODO(synk): input_lengths / teacher / tf_rate (and the reference's discarded
    # `outputs.unsqueeze(1)`) do not affect the forward pass and are ignored.
    del input_lengths, teacher, tf_rate
    B, T, D_in = inputs.shape
    hidden = params["w_out"].shape[1]
    L = params["wh"].shape[0]
    M = B * T

    # Row-packing factor so the hidden dim fills all 128 lanes.
    G = _LANES // hidden if (hidden <= _LANES and _LANES % hidden == 0) else 1
    slab = G * hidden

    # Pad row count so it tiles evenly (no hard divisibility assert).
    M_s = pl.cdiv(M, G)                                       # slab rows with real data
    tm = _TM_SLAB if M_s > _TM_SLAB else max(8, 8 * pl.cdiv(M_s, 8))
    M_s_pad = tm * pl.cdiv(M_s, tm)
    grid = (M_s_pad // tm,)

    compute_dtype = jnp.bfloat16
    x2d = inputs.reshape(M, D_in)
    pad_rows = M_s_pad * G - M
    if pad_rows:
        x2d = jnp.pad(x2d, ((0, pad_rows), (0, 0)))
    x_slab = x2d.reshape(M_s_pad, G * D_in).astype(compute_dtype)

    w_in, b_in, w_hw, b_hw, w_out, b_out = _pack_params(params, G, compute_dtype)

    kernel = functools.partial(_highway_tts_kernel, num_highway=L, slab=slab)

    flops = 2 * M_s_pad * slab * (G * D_in + L * 2 * slab + slab)
    transcendentals = M_s_pad * slab * L
    bytes_accessed = (
        x_slab.size * x_slab.dtype.itemsize + M_s_pad * slab * 4
        + (w_in.size + w_hw.size + w_out.size) * w_in.dtype.itemsize
        + (b_in.size + b_hw.size + b_out.size) * 4)

    out_slab = pl.pallas_call(
        kernel,
        out_shape=jax.ShapeDtypeStruct((M_s_pad, slab), jnp.float32),
        grid_spec=pltpu.PrefetchScalarGridSpec(
            num_scalar_prefetch=0,
            grid=grid,
            in_specs=[
                pl.BlockSpec((tm, G * D_in), lambda i: (i, 0)),          # x slab tile
                pl.BlockSpec((G * D_in, slab), lambda i: (0, 0)),        # W_in (block-diag)
                pl.BlockSpec((1, slab), lambda i: (0, 0)),               # b_in (lane-tiled)
                pl.BlockSpec((L, slab, 2 * slab), lambda i: (0, 0, 0)),  # [Wh|Wt] stack
                pl.BlockSpec((L, 1, 2 * slab), lambda i: (0, 0, 0)),     # [bh|bt] stack
                pl.BlockSpec((slab, slab), lambda i: (0, 0)),            # W_out (block-diag)
                pl.BlockSpec((1, slab), lambda i: (0, 0)),               # b_out
            ],
            out_specs=pl.BlockSpec((tm, slab), lambda i: (i, 0)),        # lane-dense store
        ),
        compiler_params=pltpu.CompilerParams(dimension_semantics=("parallel",)),
        cost_estimate=pl.CostEstimate(flops=flops,
                                      transcendentals=transcendentals,
                                      bytes_accessed=bytes_accessed),
    )(x_slab, w_in, b_in, w_hw, b_hw, w_out, b_out)

    # Undo the slab packing (row-major bitwise identical), drop the padded rows,
    # then apply the module's final reshape.
    out2d = out_slab.reshape(M_s_pad * G, hidden)[:M]
    outputs = out2d.reshape(B, T, hidden).reshape(-1, T * ratio, hidden // ratio)
    return outputs, None, None


def _reference_forward(inputs, params, ratio):
    """Pure-JAX reference with the same bf16-matmul / f32-accumulate precision."""
    B, T, _ = inputs.shape
    cd = jnp.bfloat16
    h = (jnp.dot(inputs.reshape(B * T, -1).astype(cd), params["w_in"].astype(cd),
                 preferred_element_type=jnp.float32) + params["b_in"])
    for l in range(params["wh"].shape[0]):
        hh = jnp.maximum(
            jnp.dot(h.astype(cd), params["wh"][l].astype(cd),
                    preferred_element_type=jnp.float32) + params["bh"][l], 0.0)
        tt = jax.nn.sigmoid(
            jnp.dot(h.astype(cd), params["wt"][l].astype(cd),
                    preferred_element_type=jnp.float32) + params["bt"][l])
        h = h + tt * (hh - h)
    out = (jnp.dot(h.astype(cd), params["w_out"].astype(cd),
                   preferred_element_type=jnp.float32) + params["b_out"])
    hidden = out.shape[-1]
    return out.reshape(B, T, hidden).reshape(-1, T * ratio, hidden // ratio)


if __name__ == "__main__":
    # Small shapes consistent with the module:
    #   batch=2, seq=8, input_dim=32, mel_dim=8, ratio=4 -> hidden_dim=32, num_layers=3
    B, T = 2, 8
    input_dim, mel_dim, num_layers, ratio = 32, 8, 3, 4

    key = jax.random.PRNGKey(0)
    k_x, k_p = jax.random.split(key)
    inputs = jax.random.normal(k_x, (B, T, input_dim), jnp.float32)
    input_lengths = jnp.full((B,), T, jnp.int32)                # unused by forward
    teacher = jnp.zeros((B, T * ratio, mel_dim), jnp.float32)   # unused by forward
    params = init_params(k_p, input_dim, mel_dim, num_layers, ratio)

    outputs, alignments, stops = highway_tts_forward(
        inputs, input_lengths, teacher, params, ratio, tf_rate=0.0)
    outputs = jax.block_until_ready(outputs)

    expected = _reference_forward(inputs, params, ratio)
    assert outputs.shape == (B, T * ratio, mel_dim), outputs.shape
    assert jnp.allclose(outputs, expected, atol=2e-3, rtol=2e-3)
    assert alignments is None and stops is None

    print("KERNEL_OK")
</pallas_src>

<mosaic_0001>
module attributes {stable_mosaic.version = 11 : i64} {
  func.func @_highway_tts_kernel(%arg0: i32, %arg1: memref<8x128xbf16, #tpu.memory_space<vmem>>, %arg2: memref<128x128xbf16, #tpu.memory_space<vmem>>, %arg3: memref<1x128xf32, #tpu.memory_space<vmem>>, %arg4: memref<2x128x256xbf16, #tpu.memory_space<vmem>>, %arg5: memref<2x1x256xf32, #tpu.memory_space<vmem>>, %arg6: memref<128x128xbf16, #tpu.memory_space<vmem>>, %arg7: memref<1x128xf32, #tpu.memory_space<vmem>>, %arg8: memref<8x128xf32, #tpu.memory_space<vmem>>) attributes {dimension_semantics = [#tpu.dimension_semantics<parallel>], iteration_bounds = array<i64: 1>, scalar_prefetch = 0 : i64, scratch_operands = 0 : i64, tpu.core_type = #tpu.core_type<tc>, window_params = [{transform_indices = @transform_0, window_bounds = array<i64: 8, 128>}, {pipeline_mode = #tpu.pipeline_mode<synchronous>, transform_indices = @transform_1, window_bounds = array<i64: 128, 128>}, {pipeline_mode = #tpu.pipeline_mode<synchronous>, transform_indices = @transform_2, window_bounds = array<i64: 1, 128>}, {pipeline_mode = #tpu.pipeline_mode<synchronous>, transform_indices = @transform_3, window_bounds = array<i64: 2, 128, 256>}, {pipeline_mode = #tpu.pipeline_mode<synchronous>, transform_indices = @transform_4, window_bounds = array<i64: 2, 1, 256>}, {pipeline_mode = #tpu.pipeline_mode<synchronous>, transform_indices = @transform_5, window_bounds = array<i64: 128, 128>}, {pipeline_mode = #tpu.pipeline_mode<synchronous>, transform_indices = @transform_6, window_bounds = array<i64: 1, 128>}, {transform_indices = @transform_7, window_bounds = array<i64: 8, 128>}]} {
    %c0 = arith.constant 0 : index
    %c0_0 = arith.constant 0 : index
    %0 = vector.load %arg1[%c0, %c0_0] : memref<8x128xbf16, #tpu.memory_space<vmem>>, vector<8x128xbf16>
    %c0_1 = arith.constant 0 : index
    %c0_2 = arith.constant 0 : index
    %1 = vector.load %arg2[%c0_1, %c0_2] : memref<128x128xbf16, #tpu.memory_space<vmem>>, vector<128x128xbf16>
    %cst = arith.constant dense<0.000000e+00> : vector<8x128xf32>
    %2 = tpu.matmul %0, %1, %cst {dimension_numbers = #tpu.dot_dimension_numbers<[1], [0], [0], [1], [0, 0, 1, 1], [], []>} : vector<8x128xbf16>, vector<128x128xbf16>, vector<8x128xf32> -> vector<8x128xf32>
    %c0_3 = arith.constant 0 : index
    %c0_4 = arith.constant 0 : index
    %3 = vector.load %arg3[%c0_3, %c0_4] : memref<1x128xf32, #tpu.memory_space<vmem>>, vector<1x128xf32>
    %4 = vector.broadcast %3 : vector<1x128xf32> to vector<8x128xf32>
    %5 = arith.addf %2, %4 : vector<8x128xf32>
    %6 = arith.truncf %5 : vector<8x128xf32> to vector<8x128xbf16>
    %c0_5 = arith.constant 0 : index
    %c0_6 = arith.constant 0 : index
    %c0_7 = arith.constant 0 : index
    %7 = vector.load %arg4[%c0_5, %c0_6, %c0_7] : memref<2x128x256xbf16, #tpu.memory_space<vmem>>, vector<1x128x256xbf16>
    %8 = vector.shape_cast %7 : vector<1x128x256xbf16> to vector<128x256xbf16>
    %cst_8 = arith.constant dense<0.000000e+00> : vector<8x256xf32>
    %9 = tpu.matmul %6, %8, %cst_8 {dimension_numbers = #tpu.dot_dimension_numbers<[1], [0], [0], [1], [0, 0, 1, 1], [], []>} : vector<8x128xbf16>, vector<128x256xbf16>, vector<8x256xf32> -> vector<8x256xf32>
    %c0_9 = arith.constant 0 : index
    %c0_10 = arith.constant 0 : index
    %c0_11 = arith.constant 0 : index
    %10 = vector.load %arg5[%c0_9, %c0_10, %c0_11] : memref<2x1x256xf32, #tpu.memory_space<vmem>>, vector<1x1x256xf32>
    %11 = vector.shape_cast %10 : vector<1x1x256xf32> to vector<1x256xf32>
    %12 = vector.broadcast %11 : vector<1x256xf32> to vector<8x256xf32>
    %13 = arith.addf %9, %12 : vector<8x256xf32>
    %14 = vector.extract_strided_slice %13 {offsets = [0, 0], sizes = [8, 128], strides = [1, 1]} : vector<8x256xf32> to vector<8x128xf32>
    %cst_12 = arith.constant 0.000000e+00 : f32
    %15 = vector.broadcast %cst_12 : f32 to vector<8x128xf32>
    %16 = arith.maximumf %14, %15 : vector<8x128xf32>
    %17 = vector.extract_strided_slice %13 {offsets = [0, 128], sizes = [8, 128], strides = [1, 1]} : vector<8x256xf32> to vector<8x128xf32>
    %18 = arith.negf %17 : vector<8x128xf32>
    %19 = math.exp %18 : vector<8x128xf32>
    %cst_13 = arith.constant 1.000000e+00 : f32
    %20 = vector.broadcast %cst_13 : f32 to vector<8x128xf32>
    %21 = arith.addf %20, %19 : vector<8x128xf32>
    %22 = arith.divf %20, %21 : vector<8x128xf32>
    %23 = arith.subf %16, %5 : vector<8x128xf32>
    %24 = arith.mulf %22, %23 : vector<8x128xf32>
    %25 = arith.addf %5, %24 : vector<8x128xf32>
    %26 = arith.truncf %25 : vector<8x128xf32> to vector<8x128xbf16>
    %c1 = arith.constant 1 : index
    %c0_14 = arith.constant 0 : index
    %c0_15 = arith.constant 0 : index
    %27 = vector.load %arg4[%c1, %c0_14, %c0_15] : memref<2x128x256xbf16, #tpu.memory_space<vmem>>, vector<1x128x256xbf16>
    %28 = vector.shape_cast %27 : vector<1x128x256xbf16> to vector<128x256xbf16>
    %cst_16 = arith.constant dense<0.000000e+00> : vector<8x256xf32>
    %29 = tpu.matmul %26, %28, %cst_16 {dimension_numbers = #tpu.dot_dimension_numbers<[1], [0], [0], [1], [0, 0, 1, 1], [], []>} : vector<8x128xbf16>, vector<128x256xbf16>, vector<8x256xf32> -> vector<8x256xf32>
    %c1_17 = arith.constant 1 : index
    %c0_18 = arith.constant 0 : index
    %c0_19 = arith.constant 0 : index
    %30 = vector.load %arg5[%c1_17, %c0_18, %c0_19] : memref<2x1x256xf32, #tpu.memory_space<vmem>>, vector<1x1x256xf32>
    %31 = vector.shape_cast %30 : vector<1x1x256xf32> to vector<1x256xf32>
    %32 = vector.broadcast %31 : vector<1x256xf32> to vector<8x256xf32>
    %33 = arith.addf %29, %32 : vector<8x256xf32>
    %34 = vector.extract_strided_slice %33 {offsets = [0, 0], sizes = [8, 128], strides = [1, 1]} : vector<8x256xf32> to vector<8x128xf32>
    %cst_20 = arith.constant 0.000000e+00 : f32
    %35 = vector.broadcast %cst_20 : f32 to vector<8x128xf32>
    %36 = arith.maximumf %34, %35 : vector<8x128xf32>
    %37 = vector.extract_strided_slice %33 {offsets = [0, 128], sizes = [8, 128], strides = [1, 1]} : vector<8x256xf32> to vector<8x128xf32>
    %38 = arith.negf %37 : vector<8x128xf32>
    %39 = math.exp %38 : vector<8x128xf32>
    %cst_21 = arith.constant 1.000000e+00 : f32
    %40 = vector.broadcast %cst_21 : f32 to vector<8x128xf32>
    %41 = arith.addf %40, %39 : vector<8x128xf32>
    %42 = arith.divf %40, %41 : vector<8x128xf32>
    %43 = arith.subf %36, %25 : vector<8x128xf32>
    %44 = arith.mulf %42, %43 : vector<8x128xf32>
    %45 = arith.addf %25, %44 : vector<8x128xf32>
    %46 = arith.truncf %45 : vector<8x128xf32> to vector<8x128xbf16>
    %c0_22 = arith.constant 0 : index
    %c0_23 = arith.constant 0 : index
    %47 = vector.load %arg6[%c0_22, %c0_23] : memref<128x128xbf16, #tpu.memory_space<vmem>>, vector<128x128xbf16>
    %cst_24 = arith.constant dense<0.000000e+00> : vector<8x128xf32>
    %48 = tpu.matmul %46, %47, %cst_24 {dimension_numbers = #tpu.dot_dimension_numbers<[1], [0], [0], [1], [0, 0, 1, 1], [], []>} : vector<8x128xbf16>, vector<128x128xbf16>, vector<8x128xf32> -> vector<8x128xf32>
    %c0_25 = arith.constant 0 : index
    %c0_26 = arith.constant 0 : index
    %49 = vector.load %arg7[%c0_25, %c0_26] : memref<1x128xf32, #tpu.memory_space<vmem>>, vector<1x128xf32>
    %50 = vector.broadcast %49 : vector<1x128xf32> to vector<8x128xf32>
    %51 = arith.addf %48, %50 : vector<8x128xf32>
    %c0_27 = arith.constant 0 : index
    %c0_28 = arith.constant 0 : index
    %52 = vector.load %arg8[%c0_27, %c0_28] : memref<8x128xf32, #tpu.memory_space<vmem>>, vector<8x128xf32>
    tpu.vector_store %arg8[%c0_27, %c0_28], %51 {strides = array<i32>} : memref<8x128xf32, #tpu.memory_space<vmem>>, vector<8x128xf32>,
    return
  }
  func.func @transform_0(%arg0: i32) -> (i32, i32) {
    %c0_i32 = arith.constant 0 : i32
    %c0_i32_0 = arith.constant 0 : i32
    return %arg0, %c0_i32 : i32, i32
  }
  func.func @transform_1(%arg0: i32) -> (i32, i32) {
    %c0_i32 = arith.constant 0 : i32
    %c0_i32_0 = arith.constant 0 : i32
    %c0_i32_1 = arith.constant 0 : i32
    return %c0_i32, %c0_i32_0 : i32, i32
  }
  func.func @transform_2(%arg0: i32) -> (i32, i32) {
    %c0_i32 = arith.constant 0 : i32
    %c0_i32_0 = arith.constant 0 : i32
    %c0_i32_1 = arith.constant 0 : i32
    return %c0_i32, %c0_i32_0 : i32, i32
  }
  func.func @transform_3(%arg0: i32) -> (i32, i32, i32) {
    %c0_i32 = arith.constant 0 : i32
    %c0_i32_0 = arith.constant 0 : i32
    %c0_i32_1 = arith.constant 0 : i32
    %c0_i32_2 = arith.constant 0 : i32
    return %c0_i32, %c0_i32_0, %c0_i32_1 : i32, i32, i32
  }
  func.func @transform_4(%arg0: i32) -> (i32, i32, i32) {
    %c0_i32 = arith.constant 0 : i32
    %c0_i32_0 = arith.constant 0 : i32
    %c0_i32_1 = arith.constant 0 : i32
    %c0_i32_2 = arith.constant 0 : i32
    return %c0_i32, %c0_i32_0, %c0_i32_1 : i32, i32, i32
  }
  func.func @transform_5(%arg0: i32) -> (i32, i32) {
    %c0_i32 = arith.constant 0 : i32
    %c0_i32_0 = arith.constant 0 : i32
    %c0_i32_1 = arith.constant 0 : i32
    return %c0_i32, %c0_i32_0 : i32, i32
  }
  func.func @transform_6(%arg0: i32) -> (i32, i32) {
    %c0_i32 = arith.constant 0 : i32
    %c0_i32_0 = arith.constant 0 : i32
    %c0_i32_1 = arith.constant 0 : i32
    return %c0_i32, %c0_i32_0 : i32, i32
  }
  func.func @transform_7(%arg0: i32) -> (i32, i32) {
    %c0_i32 = arith.constant 0 : i32
    %c0_i32_0 = arith.constant 0 : i32
    return %arg0, %c0_i32 : i32, i32
  }
}

</mosaic_0001>

<bundles_post_ra>
// kernel: tpu_custom_call.1
= control target key start
LH: loop header
LB: loop body
LE: loop exit
PB: predicated region body
PF: predicated region fallthrough
CT: control target
= control target key end

     0   :  { %12 = vsyncpa [#allocation3], 0  ;;  %s1108_s0 = inlined_call_operand.hbm [shape: bf16[8,128], index: 0, kind: input, shape index: {}]   ;;  %s1109_s1 = inlined_call_operand.hbm [shape: bf16[128,128], index: 1, kind: input, shape index: {}]   ;;  %s1110_s2 = inlined_call_operand.vmem [shape: f32[1,128], index: 2, kind: input, shape index: {}]   ;;  %s1111_s3 = inlined_call_operand.hbm [shape: bf16[2,128,256], index: 3, kind: input, shape index: {}]   ;;  %s1112_s4 = inlined_call_operand.vmem [shape: f32[2,1,256], index: 4, kind: input, shape index: {}]   ;;  %s1113_s5 = inlined_call_operand.hbm [shape: bf16[128,128], index: 5, kind: input, shape index: {}]   ;;  %s1114_s6 = inlined_call_operand.vmem [shape: f32[1,128], index: 6, kind: input, shape index: {}]   ;;  %s1115_s7 = inlined_call_operand.hbm [shape: f32[8,128], index: 7, kind: output, shape index: {}]  }
   0x1   :  { %13 = vsyncpa [#allocation6], 0 }
   0x2   :  { %14 = vsyncpa [#allocation9], 0 }
   0x3   :  { %15 = vsyncpa [#allocation4], 0  ;;  %s958_s24 = smov [#allocation5]   ;;  %s840_s28 = scalar_lea.hbm %s1109_s1, 1024 }
   0x4   :  { %s31_s25 = sshll.u32 %s958_s24, 4  ;;  %p841_p0 = scmp.ne.s32.totalorder %s1109_s1, %s840_s28  ;;  %s32_s25 = int_to_ptr.vmem [resolvable:$true] %s31_s25 }
   0x5   :  { %p844_p1 = scmp.lt.u32.totalorder %s840_s28, %s1109_s1 }
   0x7   :  { %p846_p2 = pnand %p844_p1, %p841_p0 }
   0x9   :  { %849 = shalt.err (!%p846_p2)
}
   0xa   :  { %s850_s10 = scalar_lea.vmem %s32_s25, 1024  ;;  %p855_p4 = scmp.lt.s32.totalorder %s32_s25, %s32_s25 }
   0xb   :  { %p851_p3 = scmp.ne.s32.totalorder %s32_s25, %s850_s10  ;;  %p856_p5 = scmp.lt.s32.totalorder %s850_s10, %s850_s10 }
   0xd   :  { %p857_p6 = por %p856_p5, %p855_p4 }
   0xf   :  { %p858_p7 = pnand %p857_p6, %p851_p3 }
  0x11   :  { %861 = shalt.err (!%p858_p7)
}
  0x12   :  { %s959_s11 = smov 64   ;;  %s960_s12 = smov 4  }
  0x13   :  { %37 = dma.hbm_to_vmem [thread:$0]  %s1109_s1, 1024, %s32_s25, [#allocation6], %s959_s11, %s959_s11, %s960_s12  }
  0x14   :  { %s961_s15 = smov [#allocation2]   ;;  %s962_s17 = smov [#allocation7]  }
  0x15   :  { %s22_s16 = sshll.u32 %s961_s15, 4  ;;  %s45_s18 = sshll.u32 %s962_s17, 4  ;;  %s23_s16 = int_to_ptr.vmem [resolvable:$true] %s22_s16  ;;  %s46_s18 = int_to_ptr.vmem [resolvable:$true] %s45_s18 }
  0x16   :  { %s862_s21 = scalar_lea.hbm %s1108_s0, 64 }
  0x17   :  { %p863_p8 = scmp.ne.s32.totalorder %s1108_s0, %s862_s21  ;;  %p866_p9 = scmp.lt.u32.totalorder %s862_s21, %s1108_s0 }
  0x19   :  { %p868_p10 = pnand %p866_p9, %p863_p8 }
  0x1b   :  { %871 = shalt.err (!%p868_p10)
}
  0x1c   :  { %s872_s1 = scalar_lea.vmem %s23_s16, 64  ;;  %p877_p12 = scmp.lt.s32.totalorder %s23_s16, %s23_s16 }
  0x1d   :  { %p873_p11 = scmp.ne.s32.totalorder %s23_s16, %s872_s1  ;;  %p878_p13 = scmp.lt.s32.totalorder %s872_s1, %s872_s1 }
  0x1f   :  { %p879_p0 = por %p878_p13, %p877_p12 }
  0x21   :  { %p880_p1 = pnand %p879_p0, %p873_p11 }
  0x23   :  { %883 = shalt.err (!%p880_p1)
}
  0x24   :  { %25 = dma.hbm_to_vmem [thread:$0]  %s1108_s0, 64, %s23_s16, [#allocation3]  }
  0x25   :  { %s884_s30 = scalar_lea.hbm %s1111_s3, 4096 }
  0x26   :  { %p885_p2 = scmp.ne.s32.totalorder %s1111_s3, %s884_s30  ;;  %p888_p3 = scmp.lt.u32.totalorder %s884_s30, %s1111_s3 }
  0x28   :  { %p890_p4 = pnand %p888_p3, %p885_p2 }
  0x2a   :  { %893 = shalt.err (!%p890_p4)
}
  0x2b   :  { %s894_s14 = scalar_lea.vmem %s46_s18, 4096  ;;  %p899_p6 = scmp.lt.s32.totalorder %s46_s18, %s46_s18 }
  0x2c   :  { %p895_p5 = scmp.ne.s32.totalorder %s46_s18, %s894_s14  ;;  %p900_p7 = scmp.lt.s32.totalorder %s894_s14, %s894_s14 }
  0x2e   :  { %p901_p8 = por %p900_p7, %p899_p6 }
  0x30   :  { %p902_p9 = pnand %p901_p8, %p895_p5 }
  0x32   :  { %905 = shalt.err (!%p902_p9)
}
  0x33   :  { %s963_s0 = smov 128   ;;  %s964_s15 = smov 8  }
  0x34   :  { %51 = dma.hbm_to_vmem [thread:$0]  %s1111_s3, 4096, %s46_s18, [#allocation6], %s963_s0, %s963_s0, %s964_s15  }
  0x35   :  { %s965_s19 = smov [#allocation8]   ;;  %s906_s23 = scalar_lea.hbm %s1113_s5, 1024 }
  0x36   :  { %s59_s20 = sshll.u32 %s965_s19, 4  ;;  %p907_p10 = scmp.ne.s32.totalorder %s1113_s5, %s906_s23  ;;  %s60_s20 = int_to_ptr.vmem [resolvable:$true] %s59_s20 }
  0x37   :  { %p910_p11 = scmp.lt.u32.totalorder %s906_s23, %s1113_s5 }
  0x39   :  { %p912_p12 = pnand %p910_p11, %p907_p10 }
  0x3b   :  { %915 = shalt.err (!%p912_p12)
}
  0x3c   :  { %s916_s27 = scalar_lea.vmem %s60_s20, 1024  ;;  %p921_p0 = scmp.lt.s32.totalorder %s60_s20, %s60_s20 }
  0x3d   :  { %p917_p13 = scmp.ne.s32.totalorder %s60_s20, %s916_s27  ;;  %p922_p1 = scmp.lt.s32.totalorder %s916_s27, %s916_s27 }
  0x3f   :  { %p923_p2 = por %p922_p1, %p921_p0 }
  0x41   :  { %p924_p3 = pnand %p923_p2, %p917_p13 }
  0x43   :  { %927 = shalt.err (!%p924_p3)
}
  0x44   :  { %65 = dma.hbm_to_vmem [thread:$0]  %s1113_s5, 1024, %s60_s20, [#allocation9], %s959_s11, %s959_s11, %s960_s12  }
  0x45   :  { %950 = dma.done.wait [#allocation3], 64  }
  0x46   :  { %951 = vsyncadd [#allocation3], 4294967232 }
  0x47   :  { %952 = dma.done.wait [#allocation6], 5120  }
  0x48   :  { %953 = vsyncadd [#allocation6], 4294962176 }
  0x49   :  { %954 = dma.done.wait [#allocation9], 1024  }
  0x4a   :  { %955 = vsyncadd [#allocation9], 4294966272  ;;  %v966_v0 = vmov 0.0   ;;  %vm967_vm0 = vmmov 0   ;;  %v768_v1 = vld [vmem:[#allocation5] sm:$0xff]   ;;  %v769_v2 = vld [vmem:[#allocation5 + $0x8] sm:$0xff]   ;;  %v212_v50 = vlaneseq }
  0x4b   :  { %716 = vmatprep.subr.bf16.mxu0 %v966_v0  ;;  %732 = vmatprep.mubr.msk.bf16.mxu0 %vm967_vm0, %v966_v0  ;;  %v770_v3 = vld [vmem:[#allocation5 + $0x10] sm:$0xff]   ;;  %v776_v4 = vld [vmem:[#allocation7 + $0x4] ss:$8 sps:$4 sm:$0xff]   ;;  %v778_v5 = vld [vmem:[#allocation7] ss:$8 sps:$4 sm:$0xff]   ;;  %v968_v26 = vmov 0  }
  0x4c   :  { %717 = vmatpush3.bf16.msra.mxu0 %v768_v1  ;;  %v771_v6 = vld [vmem:[#allocation5 + $0x18] sm:$0xff]   ;;  %302 = vmatprep.subr.bf16.mxu1 %v776_v4  ;;  %v782_v9 = vld [vmem:[#allocation7 + $0x24] ss:$8 sps:$4 sm:$0xff]   ;;  %v784_v11 = vld [vmem:[#allocation7 + $0x20] ss:$8 sps:$4 sm:$0xff]   ;;  %v213_v51 = vshrl.u32 %v212_v50, 7 }
  0x4d   :  { %718 = vmatprep.subr.bf16.mxu0 %v966_v0  ;;  %v779_v7 = vld [vmem:[#allocation7 + $0x14] ss:$8 sps:$4 sm:$0xff]   ;;  %303 = vmatpush1.bf16.msra.mxu1 %v778_v5  ;;  %v781_v8 = vld [vmem:[#allocation7 + $0x10] ss:$8 sps:$4 sm:$0xff]   ;;  %v772_v10 = vld [vmem:[#allocation5 + $0x20] sm:$0xff]   ;;  %s969_s8 = smov [#allocation10]  }
  0x4e   :  { %304 = vmatprep.subr.bf16.mxu1 %v779_v7  ;;  %v773_v12 = vld [vmem:[#allocation5 + $0x28] sm:$0xff]   ;;  %v785_v13 = vld [vmem:[#allocation7 + $0x34] ss:$8 sps:$4 sm:$0xff]   ;;  %v787_v14 = vld [vmem:[#allocation7 + $0x30] ss:$8 sps:$4 sm:$0xff]   ;;  %334 = vmatprep.mubr.bf16.mxu1 %v968_v26  ;;  %v218_v52 = vsub.s32 1, %v213_v51 }
  0x4f   :  { %v788_v15 = vld [vmem:[#allocation7 + $0x44] ss:$8 sps:$4 sm:$0xff]   ;;  %v774_v16 = vld [vmem:[#allocation5 + $0x30] sm:$0xff]   ;;  %v790_v17 = vld [vmem:[#allocation7 + $0x40] ss:$8 sps:$4 sm:$0xff]   ;;  %v214_v61 = vsub.s32 0, %v213_v51 }
  0x50   :  { %719 = vmatpush3.bf16.msra.mxu0 %v769_v2  ;;  %v791_v18 = vld [vmem:[#allocation7 + $0x54] ss:$8 sps:$4 sm:$0xff]   ;;  %v793_v20 = vld [vmem:[#allocation7 + $0x50] ss:$8 sps:$4 sm:$0xff]   ;;  %v794_v21 = vld [vmem:[#allocation7 + $0x64] ss:$8 sps:$4 sm:$0xff]  }
  0x51   :  { %720 = vmatprep.subr.bf16.mxu0 %v966_v0  ;;  %305 = vmatpush1.bf16.msra.mxu1 %v781_v8  ;;  %v775_v19 = vld [vmem:[#allocation5 + $0x38] sm:$0xff]   ;;  %v796_v23 = vld [vmem:[#allocation7 + $0x60] ss:$8 sps:$4 sm:$0xff]   ;;  %v802_v34 = vld [vmem:[#allocation7 + $0x84] ss:$8 sps:$4 sm:$0xff]   ;;  %s634_s9 = sshll.u32 %s969_s8, 4  ;;  %s635_s9 = int_to_ptr.vmem [resolvable:$true] %s634_s9 }
  0x52   :  { %306 = vmatprep.subr.bf16.mxu1 %v782_v9  ;;  %v81_v22 = vld [vmem:[#allocation2] sm:$0xf]  ;;  %v799_v25 = vld [vmem:[#allocation7 + $0x70] ss:$8 sps:$4 sm:$0xff]   ;;  %v800_v35 = vld [vmem:[#allocation7 + $0x80] ss:$8 sps:$4 sm:$0xff]   ;;  %p933_p5 = scmp.lt.s32.totalorder %s635_s9, %s635_s9 }
  0x53   :  { %v797_v24 = vld [vmem:[#allocation7 + $0x74] ss:$8 sps:$4 sm:$0xff]   ;;  %v803_v37 = vld [vmem:[#allocation7 + $0x90] ss:$8 sps:$4 sm:$0xff]   ;;  %v808_v38 = vld [vmem:[#allocation7 + $0xa4] ss:$8 sps:$4 sm:$0xff]  }
  0x54   :  { %721 = vmatpush3.bf16.msra.mxu0 %v770_v3  ;;  %v645_v27 = vld [vmem:[%s1110_s2] ss:$0 sm:$0xff]  ;;  %v806_v39 = vld [vmem:[#allocation7 + $0xa0] ss:$8 sps:$4 sm:$0xff]   ;;  %v809_v41 = vld [vmem:[#allocation7 + $0xb0] ss:$8 sps:$4 sm:$0xff]  }
  0x55   :  { %722 = vmatprep.subr.bf16.mxu0 %v966_v0  ;;  %307 = vmatpush1.bf16.msra.mxu1 %v784_v11  ;;  %v805_v36 = vld [vmem:[#allocation7 + $0x94] ss:$8 sps:$4 sm:$0xff]   ;;  %v814_v42 = vld [vmem:[#allocation7 + $0xc4] ss:$8 sps:$4 sm:$0xff]   ;;  %v812_v43 = vld [vmem:[#allocation7 + $0xc0] ss:$8 sps:$4 sm:$0xff]  }
  0x56   :  { %308 = vmatprep.subr.bf16.mxu1 %v785_v13  ;;  %v811_v40 = vld [vmem:[#allocation7 + $0xb4] ss:$8 sps:$4 sm:$0xff]   ;;  %v815_v45 = vld [vmem:[#allocation7 + $0xd0] ss:$8 sps:$4 sm:$0xff]   ;;  %v820_v46 = vld [vmem:[#allocation7 + $0xe4] ss:$8 sps:$4 sm:$0xff]  }
  0x57   :  { %v817_v44 = vld [vmem:[#allocation7 + $0xd4] ss:$8 sps:$4 sm:$0xff]   ;;  %v818_v47 = vld [vmem:[#allocation7 + $0xe0] ss:$8 sps:$4 sm:$0xff]   ;;  %v821_v49 = vld [vmem:[#allocation7 + $0xf0] ss:$8 sps:$4 sm:$0xff]  }
  0x58   :  { %723 = vmatpush3.bf16.msra.mxu0 %v771_v6  ;;  %v823_v48 = vld [vmem:[#allocation7 + $0xf4] ss:$8 sps:$4 sm:$0xff]   ;;  %v824_v9 = vld [vmem:[#allocation8] sm:$0xff]   ;;  %s928_s10 = scalar_lea.vmem %s635_s9, 128 }
  0x59   :  { %724 = vmatprep.subr.bf16.mxu0 %v966_v0  ;;  %309 = vmatpush1.bf16.msra.mxu1 %v787_v14  ;;  %v210_v53 = vld [vmem:[%s1112_s4] sm:$0x3]  ;;  %v826_v11 = vld [vmem:[#allocation8 + $0x10] sm:$0xff]   ;;  %v828_v13 = vld [vmem:[#allocation8 + $0x20] sm:$0xff]   ;;  %p929_p4 = scmp.ne.s32.totalorder %s635_s9, %s928_s10  ;;  %p934_p6 = scmp.lt.s32.totalorder %s928_s10, %s928_s10 }
  0x5a   :  { %310 = vmatprep.subr.bf16.mxu1 %v788_v15  ;;  %v219_v54 = vrot.slane %v210_v53, %v218_v52  ;;  %v215_v63 = vrot.slane %v210_v53, %v214_v61  ;;  %v829_v14 = vld [vmem:[#allocation8 + $0x28] sm:$0xff]   ;;  %v830_v15 = vld [vmem:[#allocation8 + $0x30] sm:$0xff]  }
  0x5b   :  { %p935_p7 = por %p934_p6, %p933_p5 }
  0x5c   :  { %725 = vmatpush3.bf16.msra.mxu0 %v772_v10  ;;  %v825_v10 = vld [vmem:[#allocation8 + $0x8] sm:$0xff]  }
  0x5d   :  { %726 = vmatprep.subr.bf16.mxu0 %v966_v0  ;;  %311 = vmatpush1.bf16.msra.mxu1 %v790_v17  ;;  %v671_v17 = vld [vmem:[%s1112_s4 + $0x2] sm:$0x3]  ;;  %p936_p8 = pnand %p935_p7, %p929_p4 }
  0x5e   :  { %312 = vmatprep.subr.bf16.mxu1 %v791_v18  ;;  %v381_v18 = vrot.slane %v671_v17, %v218_v52 }
  0x60   :  { %727 = vmatpush3.bf16.msra.mxu0 %v773_v12  ;;  %v827_v12 = vld [vmem:[#allocation8 + $0x18] sm:$0xff]  }
  0x61   :  { %728 = vmatprep.subr.bf16.mxu0 %v966_v0  ;;  %313 = vmatpush1.bf16.msra.mxu1 %v793_v20 }
  0x62   :  { %314 = vmatprep.subr.bf16.mxu1 %v794_v21 }
  0x64   :  { %729 = vmatpush3.bf16.msra.mxu0 %v774_v16  ;;  %v831_v16 = vld [vmem:[#allocation8 + $0x38] sm:$0xff]  }
  0x65   :  { %730 = vmatprep.subr.bf16.mxu0 %v966_v0  ;;  %315 = vmatpush1.bf16.msra.mxu1 %v796_v23 }
  0x66   :  { %316 = vmatprep.subr.bf16.mxu1 %v797_v24 }
  0x68   :  { %731 = vmatpush3.bf16.msra.mxu0 %v775_v19 }
  0x69   :  { %317 = vmatpush1.bf16.msra.mxu1 %v799_v25  ;;  %464 = vmatprep.subr.bf16.mxu0 %v802_v34  ;;  %v689_v34 = vld [vmem:[%s1114_s6] ss:$0 sm:$0xff] }
  0x6a   :  { %736 = vmatprep.subr.bf16.mxu1 %v966_v0 }
  0x6b   :  { %733 = vmatmul.mubr.bf16.vlgmr.msra.gmra.mrb[0].mxu0 %v81_v22 }
  0x6c   :  { %496 = vmatprep.mubr.bf16.mxu0 %v968_v26  ;;  %465 = vmatpush1.bf16.msra.mxu0 %v800_v35  ;;  %v377_v26 = vrot.slane %v671_v17, %v214_v61 }
  0x6d   :  { %466 = vmatprep.subr.bf16.mxu0 %v805_v36 }
  0x70   :  { %467 = vmatpush1.bf16.msra.mxu0 %v803_v37 }
  0x71   :  { %468 = vmatprep.subr.bf16.mxu0 %v808_v38 }
  0x74   :  { %469 = vmatpush1.bf16.msra.mxu0 %v806_v39 }
  0x75   :  { %470 = vmatprep.subr.bf16.mxu0 %v811_v40 }
  0x78   :  { %471 = vmatpush1.bf16.msra.mxu0 %v809_v41 }
  0x79   :  { %472 = vmatprep.subr.bf16.mxu0 %v814_v42 }
  0x7c   :  { %473 = vmatpush1.bf16.msra.mxu0 %v812_v43 }
  0x7d   :  { %474 = vmatprep.subr.bf16.mxu0 %v817_v44 }
  0x80   :  { %475 = vmatpush1.bf16.msra.mxu0 %v815_v45 }
  0x81   :  { %476 = vmatprep.subr.bf16.mxu0 %v820_v46 }
  0x84   :  { %477 = vmatpush1.bf16.msra.mxu0 %v818_v47 }
  0x85   :  { %478 = vmatprep.subr.bf16.mxu0 %v823_v48 }
  0x88   :  { %479 = vmatpush1.bf16.msra.mxu0 %v821_v49 }
 0x13e   :  { %v187_v28 = vpop.f32.mrb[0].mxu0 }
 0x13f   :  { %v188_v29 = vadd.f32 %v645_v27, %v187_v28  ;;  %v734_v30 = vpop.f32.mrb[1].mxu0 }
 0x140   :  { %v190_v31 = vpop.f32.mrb[2].mxu0 }
 0x141   :  { %v735_v32 = vpop.f32.mrb[3].mxu0  ;;  %v193_v33 = vpack.c.bf16 %v188_v29, %v188_v29 }
 0x143   :  { %335 = vmatmul.mubr.bf16.vlgmr.msra.gmra.mrb[0].mxu1 %v193_v33 }
 0x144   :  { %752 = vmatprep.mubr.msk.bf16.mxu1 %vm967_vm0, %v966_v0  ;;  %737 = vmatpush3.bf16.msra.mxu1 %v824_v9 }
 0x145   :  { %738 = vmatprep.subr.bf16.mxu1 %v966_v0 }
 0x148   :  { %739 = vmatpush3.bf16.msra.mxu1 %v825_v10 }
 0x149   :  { %740 = vmatprep.subr.bf16.mxu1 %v966_v0 }
 0x14c   :  { %741 = vmatpush3.bf16.msra.mxu1 %v826_v11 }
 0x14d   :  { %742 = vmatprep.subr.bf16.mxu1 %v966_v0 }
 0x150   :  { %743 = vmatpush3.bf16.msra.mxu1 %v827_v12 }
 0x151   :  { %744 = vmatprep.subr.bf16.mxu1 %v966_v0 }
 0x154   :  { %745 = vmatpush3.bf16.msra.mxu1 %v828_v13 }
 0x155   :  { %746 = vmatprep.subr.bf16.mxu1 %v966_v0 }
 0x158   :  { %747 = vmatpush3.bf16.msra.mxu1 %v829_v14 }
 0x159   :  { %748 = vmatprep.subr.bf16.mxu1 %v966_v0 }
 0x15c   :  { %749 = vmatpush3.bf16.msra.mxu1 %v830_v15 }
 0x15d   :  { %750 = vmatprep.subr.bf16.mxu1 %v966_v0 }
 0x160   :  { %751 = vmatpush3.bf16.msra.mxu1 %v831_v16 }
 0x216   :  { %v336_v55 = vpop.f32.mrb[0].mxu1 }
 0x217   :  { %v338_v56 = vpop.f32.mrb[1].mxu1  ;;  %v337_v2 = vadd.f32 %v336_v55, %v215_v63 }
 0x218   :  { %v339_v57 = vadd.f32 %v338_v56, %v219_v54  ;;  %v340_v58 = vpop.f32.mrb[2].mxu1 }
 0x219   :  { %v341_v59 = vpop.f32.mrb[3].mxu1  ;;  %v343_v3 = vmax.f32 %v337_v2, 0.0 }
 0x21a   :  { %v670_v60 = vmul.f32 -1.442695, %v339_v57 }
 0x21b   :  { %v350_v4 = vsub.f32 %v343_v3, %v188_v29 }
 0x21c   :  { %832 = vpow2.f32 %v670_v60 }
 0x226   :  { %v833_v62 = vpop.eup %832 }
 0x227   :  { %v347_v1 = vadd.f32 1.0, %v833_v62 }
 0x229   :  { %834 = vrcp.f32 %v347_v1 }
 0x233   :  { %v835_v5 = vpop.eup %834 }
 0x234   :  { %v351_v6 = vmul.f32 %v835_v5, %v350_v4 }
 0x236   :  { %v352_v7 = vadd.f32 %v351_v6, %v188_v29 }
 0x238   :  { %v353_v8 = vpack.c.bf16 %v352_v7, %v352_v7 }
 0x23a   :  { %497 = vmatmul.mubr.bf16.vlgmr.msra.gmra.mrb[4].mxu0 %v353_v8 }
 0x30d   :  { %v498_v19 = vpop.f32.mrb[4].mxu0 }
 0x30e   :  { %v500_v20 = vpop.f32.mrb[5].mxu0  ;;  %v499_v28 = vadd.f32 %v498_v19, %v377_v26 }
 0x30f   :  { %v501_v21 = vadd.f32 %v500_v20, %v381_v18  ;;  %v502_v22 = vpop.f32.mrb[6].mxu0 }
 0x310   :  { %v503_v23 = vpop.f32.mrb[7].mxu0  ;;  %v505_v29 = vmax.f32 %v499_v28, 0.0 }
 0x311   :  { %v688_v24 = vmul.f32 -1.442695, %v501_v21 }
 0x312   :  { %v512_v0 = vsub.f32 %v505_v29, %v352_v7 }
 0x313   :  { %836 = vpow2.f32 %v688_v24 }
 0x31d   :  { %v837_v25 = vpop.eup %836 }
 0x31e   :  { %v509_v27 = vadd.f32 1.0, %v837_v25 }
 0x320   :  { %838 = vrcp.f32 %v509_v27 }
 0x32a   :  { %v839_v30 = vpop.eup %838 }
 0x32b   :  { %v513_v31 = vmul.f32 %v839_v30, %v512_v0 }
 0x32d   :  { %v514_v32 = vadd.f32 %v513_v31, %v352_v7 }
 0x32f   :  { %v515_v33 = vpack.c.bf16 %v514_v32, %v514_v32 }
 0x331   :  { %753 = vmatmul.mubr.bf16.vlgmr.msra.gmra.mrb[4].mxu1 %v515_v33 }
 0x404   :  { %v621_v35 = vpop.f32.mrb[4].mxu1 }
 0x405   :  { %v622_v36 = vadd.f32 %v689_v34, %v621_v35  ;;  %v754_v37 = vpop.f32.mrb[5].mxu1 }
 0x406   :  { %v624_v38 = vpop.f32.mrb[6].mxu1 }
 0x407   :  { %627 = vst [vmem:[#allocation10] sm:$0xff] %v622_v36  ;;  %v755_v39 = vpop.f32.mrb[7].mxu1 }
 0x408   :  { %939 = shalt.err (!%p936_p8)
}
 0x409   :  { %s940_s6 = scalar_lea.hbm %s1115_s7, 128 }
 0x40a   :  { %p941_p9 = scmp.ne.s32.totalorder %s1115_s7, %s940_s6  ;;  %p944_p10 = scmp.lt.u32.totalorder %s940_s6, %s1115_s7 }
 0x40c   :  { %p946_p11 = pnand %p944_p10, %p941_p9 }
 0x40e   :  { %949 = shalt.err (!%p946_p11)
}
 0x40f   :  { %637 = dma.vmem_to_hbm [thread:$0]  %s635_s9, 128, %s1115_s7, [#allocation4]  }
 0x410   :  { %956 = dma.done.wait [#allocation4], 128  }
 0x411   :  { %957 = vsyncadd [#allocation4], 4294967168 }
 0x412   :  { %641 = vsyncpa [#allocation3], 1 }
 0x413   :  { %642 = vsyncpa [#allocation6], 1 }
 0x414   :  { %643 = vsyncpa [#allocation9], 1 }
 0x415   :  { %644 = vsyncpa [#allocation4], 1 }

</bundles_post_ra>
